<compile_context>
chip_gen: v5e
topology: v5e:2x2
jax: 0.10.0
libtpu: 0.0.40
codegen_flags: <defaults>
</compile_context>

<pallas_src>
import jax
import jax.numpy as jnp
from jax.experimental import pallas as pl
from jax.experimental.pallas import tpu as pltpu


def _update_gate_kernel(hx_ref, w_ref, b_ref, o_ref):
    # hx_ref: (tb, H+I)  == [hidden | input] concatenated on the feature axis
    # w_ref:  (H+I, H)   == concat([W_h0^T, W_in^T], axis=0)  (packed once at init)
    # b_ref:  (1, H)
    # o_ref:  (tb, H)
    acc = jnp.dot(hx_ref[...], w_ref[...], preferred_element_type=jnp.float32)
    pre = acc + b_ref[...].astype(jnp.float32)          # (1,H) broadcast over batch
    o_ref[...] = jax.nn.sigmoid(pre).astype(o_ref.dtype)  # sigmoid in f32, cast at store


def prepare_update_gate_params(w_in, w_h0, b_h0, param_dtype=None):
    """One-time parameter packing. Call at parameter-init time, NOT per step.

    w_in: (hidden, input_size), w_h0: (hidden, hidden)  (torch.nn.Linear layout)
    b_h0: (hidden,)
    Returns:
      w_cat: (hidden + input_size, hidden)  == concat([W_h0^T, W_in^T], axis=0)
      b_row: (1, hidden)  float32 (bias / sigmoid path stays in f32)
    """
    H = w_h0.shape[0]
    w_cat = jnp.concatenate([jnp.asarray(w_h0).T, jnp.asarray(w_in).T], axis=0)
    if param_dtype is not None:
        w_cat = w_cat.astype(param_dtype)
    b_row = jnp.asarray(b_h0).astype(jnp.float32).reshape(1, H)
    return w_cat, b_row


def update_gate(x, h, w_cat, b_row, *, block_b=None):
    """z = sigmoid(h @ W_h0^T + b_h0 + x @ W_in^T).

    x: (B, input_size), h: (B, hidden); (w_cat, b_row) from prepare_update_gate_params.
    """
    B = x.shape[0]
    K, H = w_cat.shape                      # K = hidden + input_size

    # Single activation slab so one MXU push replaces two dots + an add.
    hx = jnp.concatenate([h, x], axis=-1)   # (B, K)

    # Batch tiling: second-to-last block dim must equal B or be a multiple of 8.
    if block_b is None:
        block_b = B if B <= 256 else 256
    if B % block_b != 0:
        block_b = B
    grid = (B // block_b,)

    out_dtype = x.dtype
    cost = pl.CostEstimate(
        flops=2 * B * K * H,
        transcendentals=B * H,  # sigmoid -> one exp per output element
        bytes_accessed=(hx.size * hx.dtype.itemsize
                        + w_cat.size * w_cat.dtype.itemsize
                        + b_row.size * b_row.dtype.itemsize
                        + B * H * jnp.dtype(out_dtype).itemsize),
    )

    return pl.pallas_call(
        _update_gate_kernel,
        out_shape=jax.ShapeDtypeStruct((B, H), out_dtype),
        grid=grid,
        in_specs=[
            pl.BlockSpec((block_b, K), lambda i: (i, 0)),   # activations: tiled over batch
            pl.BlockSpec((K, H), lambda i: (0, 0)),         # weights: VMEM-resident
            pl.BlockSpec((1, H), lambda i: (0, 0)),         # bias: resident
        ],
        out_specs=pl.BlockSpec((block_b, H), lambda i: (i, 0)),
        compiler_params=pltpu.CompilerParams(
            dimension_semantics=("parallel",),              # batch tiles are independent
        ),
        cost_estimate=cost,
    )(hx, w_cat, b_row)


if __name__ == "__main__":
    # Small shapes consistent with the module's forward.
    batch = 8
    input_size = 16
    hidden_size = 32
    forget_bias = -1.0

    key = jax.random.PRNGKey(0)
    k_x, k_h, k_win, k_wh = jax.random.split(key, 4)

    x = jax.random.normal(k_x, (batch, input_size), dtype=jnp.float32)
    h = jax.random.normal(k_h, (batch, hidden_size), dtype=jnp.float32)

    # torch.nn.Linear-shaped weights; bias init'd to forget_bias (reset_parameters).
    w_in = jax.random.normal(k_win, (hidden_size, input_size), dtype=jnp.float32) * 0.1
    w_h0 = jax.random.normal(k_wh, (hidden_size, hidden_size), dtype=jnp.float32) * 0.1
    b_h0 = jnp.full((hidden_size,), forget_bias, dtype=jnp.float32)

    # Pure-JAX reference.
    z_ref = jax.nn.sigmoid(h @ w_h0.T + b_h0 + x @ w_in.T)

    # ---- f32 path (bit-exact layout of the module) ----
    # One-time parameter packing (outside the per-step hot path).
    w_cat_f32, b_row = prepare_update_gate_params(w_in, w_h0, b_h0)
    z_f32 = jax.block_until_ready(update_gate(x, h, w_cat_f32, b_row))
    assert z_f32.shape == (batch, hidden_size)
    assert jnp.allclose(z_f32, z_ref, atol=1e-5, rtol=1e-5)

    # ---- bf16 storage path (v6e/v7x-friendly): bf16 operands, f32 accumulate/sigmoid ----
    w_cat_bf16, _ = prepare_update_gate_params(w_in, w_h0, b_h0, param_dtype=jnp.bfloat16)
    z_bf16 = jax.block_until_ready(
        update_gate(x.astype(jnp.bfloat16), h.astype(jnp.bfloat16), w_cat_bf16, b_row)
    )
    assert z_bf16.shape == (batch, hidden_size)
    assert jnp.allclose(z_bf16.astype(jnp.float32), z_ref, atol=2e-2, rtol=2e-2)

    print("KERNEL_OK")
</pallas_src>

<mosaic_0001>
module attributes {stable_mosaic.version = 11 : i64} {
  func.func @_update_gate_kernel(%arg0: i32, %arg1: memref<8x48xf32, #tpu.memory_space<vmem>>, %arg2: memref<48x32xf32, #tpu.memory_space<vmem>>, %arg3: memref<1x32xf32, #tpu.memory_space<vmem>>, %arg4: memref<8x32xf32, #tpu.memory_space<vmem>>) attributes {dimension_semantics = [#tpu.dimension_semantics<parallel>], iteration_bounds = array<i64: 1>, scalar_prefetch = 0 : i64, scratch_operands = 0 : i64, tpu.core_type = #tpu.core_type<tc>, window_params = [{transform_indices = @transform_0, window_bounds = array<i64: 8, 48>}, {pipeline_mode = #tpu.pipeline_mode<synchronous>, transform_indices = @transform_1, window_bounds = array<i64: 48, 32>}, {pipeline_mode = #tpu.pipeline_mode<synchronous>, transform_indices = @transform_2, window_bounds = array<i64: 1, 32>}, {transform_indices = @transform_3, window_bounds = array<i64: 8, 32>}]} {
    %c0 = arith.constant 0 : index
    %c0_0 = arith.constant 0 : index
    %0 = vector.load %arg1[%c0, %c0_0] : memref<8x48xf32, #tpu.memory_space<vmem>>, vector<8x48xf32>
    %c0_1 = arith.constant 0 : index
    %c0_2 = arith.constant 0 : index
    %1 = vector.load %arg2[%c0_1, %c0_2] : memref<48x32xf32, #tpu.memory_space<vmem>>, vector<48x32xf32>
    %cst = arith.constant dense<0.000000e+00> : vector<8x32xf32>
    %2 = tpu.matmul %0, %1, %cst {dimension_numbers = #tpu.dot_dimension_numbers<[1], [0], [0], [1], [0, 0, 1, 1], [], []>} : vector<8x48xf32>, vector<48x32xf32>, vector<8x32xf32> -> vector<8x32xf32>
    %c0_3 = arith.constant 0 : index
    %c0_4 = arith.constant 0 : index
    %3 = vector.load %arg3[%c0_3, %c0_4] : memref<1x32xf32, #tpu.memory_space<vmem>>, vector<1x32xf32>
    %4 = vector.broadcast %3 : vector<1x32xf32> to vector<8x32xf32>
    %5 = arith.addf %2, %4 : vector<8x32xf32>
    %6 = arith.negf %5 : vector<8x32xf32>
    %7 = math.exp %6 : vector<8x32xf32>
    %cst_5 = arith.constant 1.000000e+00 : f32
    %8 = vector.broadcast %cst_5 : f32 to vector<8x32xf32>
    %9 = arith.addf %8, %7 : vector<8x32xf32>
    %10 = arith.divf %8, %9 : vector<8x32xf32>
    %c0_6 = arith.constant 0 : index
    %c0_7 = arith.constant 0 : index
    %11 = vector.load %arg4[%c0_6, %c0_7] : memref<8x32xf32, #tpu.memory_space<vmem>>, vector<8x32xf32>
    tpu.vector_store %arg4[%c0_6, %c0_7], %10 {strides = array<i32>} : memref<8x32xf32, #tpu.memory_space<vmem>>, vector<8x32xf32>,
    return
  }
  func.func @transform_0(%arg0: i32) -> (i32, i32) {
    %c0_i32 = arith.constant 0 : i32
    %c0_i32_0 = arith.constant 0 : i32
    return %arg0, %c0_i32 : i32, i32
  }
  func.func @transform_1(%arg0: i32) -> (i32, i32) {
    %c0_i32 = arith.constant 0 : i32
    %c0_i32_0 = arith.constant 0 : i32
    %c0_i32_1 = arith.constant 0 : i32
    return %c0_i32, %c0_i32_0 : i32, i32
  }
  func.func @transform_2(%arg0: i32) -> (i32, i32) {
    %c0_i32 = arith.constant 0 : i32
    %c0_i32_0 = arith.constant 0 : i32
    %c0_i32_1 = arith.constant 0 : i32
    return %c0_i32, %c0_i32_0 : i32, i32
  }
  func.func @transform_3(%arg0: i32) -> (i32, i32) {
    %c0_i32 = arith.constant 0 : i32
    %c0_i32_0 = arith.constant 0 : i32
    return %arg0, %c0_i32 : i32, i32
  }
}

</mosaic_0001>

<bundles_post_ra>
// kernel: tpu_custom_call.1
= control target key start
LH: loop header
LB: loop body
LE: loop exit
PB: predicated region body
PF: predicated region fallthrough
CT: control target
= control target key end

     0   :  { %s169_s0 = inlined_call_operand.vmem [shape: f32[8,48], index: 0, kind: input, shape index: {}]   ;;  %s170_s1 = inlined_call_operand.vmem [shape: f32[48,32], index: 1, kind: input, shape index: {}]   ;;  %s171_s2 = inlined_call_operand.vmem [shape: f32[1,32], index: 2, kind: input, shape index: {}]   ;;  %s172_s3 = inlined_call_operand.hbm [shape: f32[8,32], index: 3, kind: output, shape index: {}]  }
   0x1   :  { %v21_v0 = vld [vmem:[%s170_s1 + $0x28] sm:$0xff]  ;;  %v20_v1 = vld [vmem:[%s170_s1 + $0x20] sm:$0xff]  ;;  %v19_v2 = vld [vmem:[%s170_s1 + $0x18] sm:$0xff] }
   0x2   :  { %40 = vmatpush.msra.mxu0 %v21_v0 }
   0x4   :  { %41 = vmatpush.msra.mxu0 %v20_v1 }
   0x5   :  { %8 = vsyncpa [#allocation3], 0  ;;  %v18_v3 = vld [vmem:[%s170_s1 + $0x10] sm:$0xff]  ;;  %v17_v4 = vld [vmem:[%s170_s1 + $0x8] sm:$0xff]  ;;  %vm26_vm0 = vcmask 392192   ;;  %vm69_vm4 = vcmask 261120  }
   0x6   :  { %42 = vmatpush.msra.mxu0 %v19_v2  ;;  %v16_v5 = vld [vmem:[%s170_s1] sm:$0xff] }
   0x7   :  { %v15_v6 = vld [vmem:[%s169_s0] sm:$0xff]  ;;  %s121_s0 = smov [#allocation2]  }
   0x8   :  { %43 = vmatpush.msra.mxu0 %v18_v3  ;;  %v90_v7 = vld [vmem:[%s171_s2] ss:$0 sm:$0xff]  ;;  %s76_s1 = sshll.u32 %s121_s0, 4  ;;  %s78_s2 = sshll.u32 %s172_s3, 4  ;;  %s77_s1 = int_to_ptr.vmem [resolvable:$true] %s76_s1  ;;  %s79_s2 = int_to_ptr.hbm [resolvable:$true] %s78_s2 }
   0xa   :  { %44 = vmatpush.msra.mxu0 %v17_v4 }
   0xc   :  { %45 = vmatpush.msra.mxu0 %v16_v5 }
   0xd   :  { %87 = vmatmul.msk.f32.vlgmr.msra.gmra.mxu0 %vm26_vm0, %v15_v6 }
  0x8a   :  { %v47_v8 = vpop.f32.mrf.mxu0 }
  0x8b   :  { %v48_v9 = vadd.f32 %v90_v7, %v47_v8 }
  0x8d   :  { %v88_v10 = vmul.f32 -1.442695, %v48_v9 }
  0x8f   :  { %91 = vpow2.f32 %v88_v10 }
  0x95   :  { %v92_v11 = vpop.eup %91 }
  0x96   :  { %v53_v12 = vadd.f32 1.0, %v92_v11 }
  0x98   :  { %93 = vrcp.f32 %v53_v12  ;;  %v65_v16 = vand.u32 2147483648, %v53_v12  ;;  %v63_v18 = vand.u32 2147483647, %v53_v12  ;;  %vm59_vm2 = vweird.f32 %v53_v12 }
  0x9a   :  { %v66_v20 = vor.u32 1.1754944e-38, %v65_v16  ;;  %vm64_vm5 = vcmp.eq.f32.partialorder %v63_v18, 8.507059e+37 }
  0x9e   :  { %v94_v13 = vpop.eup %93 }
  0x9f   :  { %v55_v14 = vmul.f32 %v94_v13, %v53_v12  ;;  %vm60_vm1 = vweird.f32 %v94_v13 }
  0xa0   :  { %vm61_vm3 = vmor %vm59_vm2, %vm60_vm1 }
  0xa1   :  { %v56_v15 = vsub.f32 1.0, %v55_v14 }
  0xa3   :  { %v57_v17 = vmul.f32 %v94_v13, %v56_v15 }
  0xa5   :  { %v58_v19 = vadd.f32 %v94_v13, %v57_v17 }
  0xa7   :  { %v62_v21 = vsel %vm61_vm3, %v94_v13, %v58_v19 }
  0xa8   :  { %v67_v22 = vsel %vm64_vm5, %v66_v20, %v62_v21 }
  0xa9   :  { %70 = vst.msk [vmem:[#allocation2] sm:$0xff] %vm69_vm4, %v67_v22 }
  0xaa   :  { %81 = dma.vmem_to_hbm [thread:$0]  %s77_s1, 128, %s79_s2, [#allocation3]  }
  0xab   :  { %119 = dma.done.wait [#allocation3], 128  }
  0xac   :  { %120 = vsyncadd [#allocation3], 4294967168 }
  0xad   :  { %86 = vsyncpa [#allocation3], 1 }

</bundles_post_ra>
